<compile_context>
chip_gen: v5e
topology: v5e:2x2
jax: 0.10.0
libtpu: 0.0.40
codegen_flags: <defaults>
</compile_context>

<pallas_src>
import functools

import jax
import jax.numpy as jnp
from jax import lax
from jax.experimental import pallas as pl
from jax.experimental.pallas import tpu as pltpu


def _round_up(a, m):
    return ((a + m - 1) // m) * m


def _erf_approx(z):
    # Abramowitz & Stegun 7.1.26 rational approximation, |error| < 1.5e-7.
    # Reciprocal rides the EUP slot (approx vrcp) + one Newton step for ~f32 precision.
    s = jnp.where(z < 0.0, -1.0, 1.0)
    a = jnp.abs(z)
    d = 1.0 + 0.3275911 * a
    t = pl.reciprocal(d, approx=True)
    t = t * (2.0 - d * t)  # one NR refinement: error ~ eps_approx^2, well under 1e-6
    poly = t * (0.254829592 + t * (-0.284496736 + t * (1.421413741
              + t * (-1.453152027 + t * 1.061405429))))
    return s * (1.0 - poly * jnp.exp(-a * a))


def _gelu(x):
    # Exact (erf-based) GELU, matching PyTorch nn.GELU() default (approximate='none').
    return 0.5 * x * (1.0 + _erf_approx(x * 0.7071067811865476))


def embedfc_kernel(x_ref, w1_ref, b1_ref, w2_ref, b2_ref, o_ref, *, matmul_dtype):
    """One batch tile of EmbedFC: GELU(x @ W1 + b1) @ W2 + b2.

    x_ref  : (TB, in_dim)        unpadded activations
    w1_ref : (in_dim, emb_dim)   resident in VMEM (constant index_map)
    b1_ref : (1, emb_dim)
    w2_ref : (emb_dim, emb_dim)
    b2_ref : (1, emb_dim)
    o_ref  : (TB, emb_dim)
    """
    x = x_ref[...]
    w1 = w1_ref[...]
    w2 = w2_ref[...]

    # Layer 1: K = in_dim matmul + broadcast bias add (MXU pads small dims internally).
    h = jnp.dot(x.astype(matmul_dtype), w1.astype(matmul_dtype),
                preferred_element_type=jnp.float32) + b1_ref[...]
    h = _gelu(h)  # GELU math always in f32 (v5e VPU/EUP have no bf16)

    # Layer 2 + bias.
    out = jnp.dot(h.astype(matmul_dtype), w2.astype(matmul_dtype),
                  preferred_element_type=jnp.float32) + b2_ref[...]
    o_ref[...] = out.astype(o_ref.dtype)


def embed_fc_forward(x, w1, b1, w2, b2, *, max_tb=512, matmul_dtype=None):
    """EmbedFC.forward.  Weights are input-major: out = gelu(x @ w1 + b1) @ w2 + b2."""
    B, in_dim = x.shape
    k_in, emb_dim = w1.shape
    assert k_in == in_dim
    assert w2.shape == (emb_dim, emb_dim)
    assert max_tb % 8 == 0

    if matmul_dtype is None:
        # bf16 MXU operands only once the problem is big enough for compute to matter;
        # keeps the tiny-shape path exactly f32.
        matmul_dtype = jnp.bfloat16 if emb_dim >= 128 else jnp.float32

    x = x.astype(jnp.float32)
    w1 = w1.astype(jnp.float32)
    w2 = w2.astype(jnp.float32)
    b1 = jnp.asarray(b1, jnp.float32).reshape(1, emb_dim)
    b2 = jnp.asarray(b2, jnp.float32).reshape(1, emb_dim)

    # Batch tiling: biggest tile up to max_tb (multiple of 8), balanced over the minimum
    # number of grid steps.  Tiny B -> single step; large B -> >=2 "parallel" steps.
    b8 = _round_up(max(B, 8), 8)
    n_steps = -(-b8 // max_tb)                 # ceil
    tb = _round_up(-(-b8 // n_steps), 8)       # per-step rows, multiple of 8
    b_pad = tb * n_steps
    if b_pad != B:
        x = jnp.pad(x, ((0, b_pad - B), (0, 0)))   # single cheap pad op (rows only)

    kernel = functools.partial(embedfc_kernel, matmul_dtype=matmul_dtype)
    out = pl.pallas_call(
        kernel,
        out_shape=jax.ShapeDtypeStruct((b_pad, emb_dim), jnp.float32),
        grid_spec=pltpu.PrefetchScalarGridSpec(
            num_scalar_prefetch=0,
            grid=(n_steps,),
            in_specs=[
                pl.BlockSpec((tb, in_dim), lambda i: (i, 0)),        # batch-tiled activations
                pl.BlockSpec((in_dim, emb_dim), lambda i: (0, 0)),   # W1 resident
                pl.BlockSpec((1, emb_dim), lambda i: (0, 0)),        # b1 resident
                pl.BlockSpec((emb_dim, emb_dim), lambda i: (0, 0)),  # W2 resident
                pl.BlockSpec((1, emb_dim), lambda i: (0, 0)),        # b2 resident
            ],
            out_specs=pl.BlockSpec((tb, emb_dim), lambda i: (i, 0)),
        ),
        compiler_params=pltpu.CompilerParams(
            dimension_semantics=("parallel",),     # v7x: both TCs split the batch axis
            vmem_limit_bytes=32 * 1024 * 1024,     # safe on v5e/v6e/v7x scoped defaults
        ),
    )(x, w1, b1, w2, b2)

    return out if b_pad == B else out[:B]


if __name__ == "__main__":
    # Small shapes consistent with EmbedFC usage (e.g. class/time embedding).
    B, in_dim, emb_dim = 16, 10, 32

    key = jax.random.PRNGKey(0)
    kx, kw1, kb1, kw2, kb2 = jax.random.split(key, 5)

    # PyTorch nn.Linear default init: U(-1/sqrt(fan_in), 1/sqrt(fan_in)).
    s1 = 1.0 / jnp.sqrt(jnp.float32(in_dim))
    s2 = 1.0 / jnp.sqrt(jnp.float32(emb_dim))
    x = jax.random.normal(kx, (B, in_dim), dtype=jnp.float32)
    w1 = jax.random.uniform(kw1, (in_dim, emb_dim), jnp.float32, -s1, s1)
    b1 = jax.random.uniform(kb1, (emb_dim,), jnp.float32, -s1, s1)
    w2 = jax.random.uniform(kw2, (emb_dim, emb_dim), jnp.float32, -s2, s2)
    b2 = jax.random.uniform(kb2, (emb_dim,), jnp.float32, -s2, s2)

    out = embed_fc_forward(x, w1, b1, w2, b2)
    jax.block_until_ready(out)
    assert out.shape == (B, emb_dim)

    # Pure-JAX reference with EXACT erf-based GELU (matches torch.nn.GELU() default).
    def ref_gelu(v):
        return 0.5 * v * (1.0 + lax.erf(v * 0.7071067811865476))

    ref = ref_gelu(x @ w1 + b1) @ w2 + b2
    max_err = float(jnp.max(jnp.abs(out - ref)))
    assert jnp.allclose(out, ref, rtol=1e-4, atol=1e-4), max_err

    print("KERNEL_OK")
</pallas_src>

<mosaic_0001>
module attributes {stable_mosaic.version = 11 : i64} {
  func.func @embedfc_kernel(%arg0: i32, %arg1: memref<16x10xf32, #tpu.memory_space<vmem>>, %arg2: memref<10x32xf32, #tpu.memory_space<vmem>>, %arg3: memref<1x32xf32, #tpu.memory_space<vmem>>, %arg4: memref<32x32xf32, #tpu.memory_space<vmem>>, %arg5: memref<1x32xf32, #tpu.memory_space<vmem>>, %arg6: memref<16x32xf32, #tpu.memory_space<vmem>>) attributes {dimension_semantics = [#tpu.dimension_semantics<parallel>], iteration_bounds = array<i64: 1>, scalar_prefetch = 0 : i64, scratch_operands = 0 : i64, tpu.core_type = #tpu.core_type<tc>, window_params = [{transform_indices = @transform_0, window_bounds = array<i64: 16, 10>}, {pipeline_mode = #tpu.pipeline_mode<synchronous>, transform_indices = @transform_1, window_bounds = array<i64: 10, 32>}, {pipeline_mode = #tpu.pipeline_mode<synchronous>, transform_indices = @transform_2, window_bounds = array<i64: 1, 32>}, {pipeline_mode = #tpu.pipeline_mode<synchronous>, transform_indices = @transform_3, window_bounds = array<i64: 32, 32>}, {pipeline_mode = #tpu.pipeline_mode<synchronous>, transform_indices = @transform_4, window_bounds = array<i64: 1, 32>}, {transform_indices = @transform_5, window_bounds = array<i64: 16, 32>}]} {
    %c0 = arith.constant 0 : index
    %c0_0 = arith.constant 0 : index
    %0 = vector.load %arg1[%c0, %c0_0] : memref<16x10xf32, #tpu.memory_space<vmem>>, vector<16x10xf32>
    %c0_1 = arith.constant 0 : index
    %c0_2 = arith.constant 0 : index
    %1 = vector.load %arg2[%c0_1, %c0_2] : memref<10x32xf32, #tpu.memory_space<vmem>>, vector<10x32xf32>
    %c0_3 = arith.constant 0 : index
    %c0_4 = arith.constant 0 : index
    %2 = vector.load %arg4[%c0_3, %c0_4] : memref<32x32xf32, #tpu.memory_space<vmem>>, vector<32x32xf32>
    %cst = arith.constant dense<0.000000e+00> : vector<16x32xf32>
    %3 = tpu.matmul %0, %1, %cst {dimension_numbers = #tpu.dot_dimension_numbers<[1], [0], [0], [1], [0, 0, 1, 1], [], []>} : vector<16x10xf32>, vector<10x32xf32>, vector<16x32xf32> -> vector<16x32xf32>
    %c0_5 = arith.constant 0 : index
    %c0_6 = arith.constant 0 : index
    %4 = vector.load %arg3[%c0_5, %c0_6] : memref<1x32xf32, #tpu.memory_space<vmem>>, vector<1x32xf32>
    %5 = vector.broadcast %4 : vector<1x32xf32> to vector<16x32xf32>
    %6 = arith.addf %3, %5 : vector<16x32xf32>
    %cst_7 = arith.constant 5.000000e-01 : f32
    %7 = vector.broadcast %cst_7 : f32 to vector<16x32xf32>
    %8 = arith.mulf %7, %6 : vector<16x32xf32>
    %cst_8 = arith.constant 0.707106769 : f32
    %9 = vector.broadcast %cst_8 : f32 to vector<16x32xf32>
    %10 = arith.mulf %6, %9 : vector<16x32xf32>
    %cst_9 = arith.constant 0.000000e+00 : f32
    %11 = vector.broadcast %cst_9 : f32 to vector<16x32xf32>
    %12 = arith.cmpf olt, %10, %11 : vector<16x32xf32>
    %cst_10 = arith.constant -1.000000e+00 : f32
    %cst_11 = arith.constant 1.000000e+00 : f32
    %13 = vector.broadcast %cst_10 : f32 to vector<16x32xf32>
    %14 = vector.broadcast %cst_11 : f32 to vector<16x32xf32>
    %15 = arith.select %12, %13, %14 : vector<16x32xi1>, vector<16x32xf32>
    %16 = math.absf %10 : vector<16x32xf32>
    %cst_12 = arith.constant 0.327591091 : f32
    %17 = vector.broadcast %cst_12 : f32 to vector<16x32xf32>
    %18 = arith.mulf %17, %16 : vector<16x32xf32>
    %cst_13 = arith.constant 1.000000e+00 : f32
    %19 = vector.broadcast %cst_13 : f32 to vector<16x32xf32>
    %20 = arith.addf %19, %18 : vector<16x32xf32>
    %21 = tpu.reciprocal %20 {approx = true} : vector<16x32xf32> -> vector<16x32xf32>
    %22 = arith.mulf %20, %21 : vector<16x32xf32>
    %cst_14 = arith.constant 2.000000e+00 : f32
    %23 = vector.broadcast %cst_14 : f32 to vector<16x32xf32>
    %24 = arith.subf %23, %22 : vector<16x32xf32>
    %25 = arith.mulf %21, %24 : vector<16x32xf32>
    %cst_15 = arith.constant 1.06140542 : f32
    %26 = vector.broadcast %cst_15 : f32 to vector<16x32xf32>
    %27 = arith.mulf %25, %26 : vector<16x32xf32>
    %cst_16 = arith.constant -1.45315206 : f32
    %28 = vector.broadcast %cst_16 : f32 to vector<16x32xf32>
    %29 = arith.addf %28, %27 : vector<16x32xf32>
    %30 = arith.mulf %25, %29 : vector<16x32xf32>
    %cst_17 = arith.constant 1.42141378 : f32
    %31 = vector.broadcast %cst_17 : f32 to vector<16x32xf32>
    %32 = arith.addf %31, %30 : vector<16x32xf32>
    %33 = arith.mulf %25, %32 : vector<16x32xf32>
    %cst_18 = arith.constant -0.284496725 : f32
    %34 = vector.broadcast %cst_18 : f32 to vector<16x32xf32>
    %35 = arith.addf %34, %33 : vector<16x32xf32>
    %36 = arith.mulf %25, %35 : vector<16x32xf32>
    %cst_19 = arith.constant 0.254829586 : f32
    %37 = vector.broadcast %cst_19 : f32 to vector<16x32xf32>
    %38 = arith.addf %37, %36 : vector<16x32xf32>
    %39 = arith.mulf %25, %38 : vector<16x32xf32>
    %cst_20 = arith.constant 0.000000e+00 : f32
    %40 = vector.broadcast %cst_20 : f32 to vector<16x32xf32>
    %41 = arith.subf %40, %16 : vector<16x32xf32>
    %42 = arith.mulf %41, %16 : vector<16x32xf32>
    %43 = math.exp %42 : vector<16x32xf32>
    %44 = arith.mulf %39, %43 : vector<16x32xf32>
    %cst_21 = arith.constant 1.000000e+00 : f32
    %45 = vector.broadcast %cst_21 : f32 to vector<16x32xf32>
    %46 = arith.subf %45, %44 : vector<16x32xf32>
    %47 = arith.mulf %15, %46 : vector<16x32xf32>
    %cst_22 = arith.constant 1.000000e+00 : f32
    %48 = vector.broadcast %cst_22 : f32 to vector<16x32xf32>
    %49 = arith.addf %48, %47 : vector<16x32xf32>
    %50 = arith.mulf %8, %49 : vector<16x32xf32>
    %cst_23 = arith.constant dense<0.000000e+00> : vector<16x32xf32>
    %51 = tpu.matmul %50, %2, %cst_23 {dimension_numbers = #tpu.dot_dimension_numbers<[1], [0], [0], [1], [0, 0, 1, 1], [], []>} : vector<16x32xf32>, vector<32x32xf32>, vector<16x32xf32> -> vector<16x32xf32>
    %c0_24 = arith.constant 0 : index
    %c0_25 = arith.constant 0 : index
    %52 = vector.load %arg5[%c0_24, %c0_25] : memref<1x32xf32, #tpu.memory_space<vmem>>, vector<1x32xf32>
    %53 = vector.broadcast %52 : vector<1x32xf32> to vector<16x32xf32>
    %54 = arith.addf %51, %53 : vector<16x32xf32>
    %c0_26 = arith.constant 0 : index
    %c0_27 = arith.constant 0 : index
    %55 = vector.load %arg6[%c0_26, %c0_27] : memref<16x32xf32, #tpu.memory_space<vmem>>, vector<16x32xf32>
    tpu.vector_store %arg6[%c0_26, %c0_27], %54 {strides = array<i32>} : memref<16x32xf32, #tpu.memory_space<vmem>>, vector<16x32xf32>,
    return
  }
  func.func @transform_0(%arg0: i32) -> (i32, i32) {
    %c0_i32 = arith.constant 0 : i32
    %c0_i32_0 = arith.constant 0 : i32
    return %arg0, %c0_i32 : i32, i32
  }
  func.func @transform_1(%arg0: i32) -> (i32, i32) {
    %c0_i32 = arith.constant 0 : i32
    %c0_i32_0 = arith.constant 0 : i32
    %c0_i32_1 = arith.constant 0 : i32
    return %c0_i32, %c0_i32_0 : i32, i32
  }
  func.func @transform_2(%arg0: i32) -> (i32, i32) {
    %c0_i32 = arith.constant 0 : i32
    %c0_i32_0 = arith.constant 0 : i32
    %c0_i32_1 = arith.constant 0 : i32
    return %c0_i32, %c0_i32_0 : i32, i32
  }
  func.func @transform_3(%arg0: i32) -> (i32, i32) {
    %c0_i32 = arith.constant 0 : i32
    %c0_i32_0 = arith.constant 0 : i32
    %c0_i32_1 = arith.constant 0 : i32
    return %c0_i32, %c0_i32_0 : i32, i32
  }
  func.func @transform_4(%arg0: i32) -> (i32, i32) {
    %c0_i32 = arith.constant 0 : i32
    %c0_i32_0 = arith.constant 0 : i32
    %c0_i32_1 = arith.constant 0 : i32
    return %c0_i32, %c0_i32_0 : i32, i32
  }
  func.func @transform_5(%arg0: i32) -> (i32, i32) {
    %c0_i32 = arith.constant 0 : i32
    %c0_i32_0 = arith.constant 0 : i32
    return %arg0, %c0_i32 : i32, i32
  }
}

</mosaic_0001>

<bundles_post_ra>
// kernel: tpu_custom_call.1
= control target key start
LH: loop header
LB: loop body
LE: loop exit
PB: predicated region body
PF: predicated region fallthrough
CT: control target
= control target key end

     0   :  { %10 = vsyncpa [#allocation3], 0  ;;  %s429_s0 = inlined_call_operand.hbm [shape: f32[16,10], index: 0, kind: input, shape index: {}]   ;;  %s430_s1 = inlined_call_operand.hbm [shape: f32[10,32], index: 1, kind: input, shape index: {}]   ;;  %s431_s2 = inlined_call_operand.vmem [shape: f32[1,32], index: 2, kind: input, shape index: {}]   ;;  %s432_s3 = inlined_call_operand.hbm [shape: f32[32,32], index: 3, kind: input, shape index: {}]   ;;  %s433_s4 = inlined_call_operand.vmem [shape: f32[1,32], index: 4, kind: input, shape index: {}]   ;;  %s434_s5 = inlined_call_operand.hbm [shape: f32[16,32], index: 5, kind: output, shape index: {}]  }
   0x1   :  { %11 = vsyncpa [#allocation6], 0 }
   0x2   :  { %12 = vsyncpa [#allocation4], 0  ;;  %s30_s20 = sshll.u32 %s430_s1, 4  ;;  %s358_s21 = smov [#allocation5]   ;;  %s31_s20 = int_to_ptr.hbm [resolvable:$true] %s30_s20 }
   0x3   :  { %s32_s22 = sshll.u32 %s358_s21, 4  ;;  %s17_s25 = sshll.u32 %s429_s0, 4  ;;  %s33_s22 = int_to_ptr.vmem [resolvable:$true] %s32_s22  ;;  %s18_s25 = int_to_ptr.hbm [resolvable:$true] %s17_s25 }
   0x4   :  { %s359_s26 = smov 128   ;;  %s360_s27 = smov 8  }
   0x5   :  { %38 = dma.hbm_to_vmem [thread:$0]  %s31_s20, 256, %s33_s22, [#allocation6], %s359_s26, %s359_s26, %s360_s27  }
   0x6   :  { %s361_s28 = smov [#allocation2]   ;;  %s45_s1 = sshll.u32 %s432_s3, 4  ;;  %s46_s1 = int_to_ptr.hbm [resolvable:$true] %s45_s1 }
   0x7   :  { %s19_s29 = sshll.u32 %s361_s28, 4  ;;  %s362_s0 = smov [#allocation7]   ;;  %s20_s29 = int_to_ptr.vmem [resolvable:$true] %s19_s29 }
   0x8   :  { %25 = dma.hbm_to_vmem [thread:$0]  %s18_s25, 256, %s20_s29, [#allocation3], %s359_s26, %s359_s26, %s360_s27  }
   0x9   :  { %s47_s7 = sshll.u32 %s362_s0, 4  ;;  %s48_s7 = int_to_ptr.vmem [resolvable:$true] %s47_s7 }
   0xa   :  { %53 = dma.hbm_to_vmem [thread:$0]  %s46_s1, 512, %s48_s7, [#allocation6], %s359_s26, %s359_s26, %s360_s27  }
   0xb   :  { %352 = dma.done.wait [#allocation3], 256  }
   0xc   :  { %353 = vsyncadd [#allocation3], 4294967040 }
   0xd   :  { %354 = dma.done.wait [#allocation6], 768  }
   0xe   :  { %355 = vsyncadd [#allocation6], 4294966528  ;;  %vm87_vm0 = vcmask 1041408   ;;  %v71_v0 = vld [vmem:[#allocation5 + $0x8] sm:$0x3]  ;;  %v70_v1 = vld [vmem:[#allocation5] sm:$0xff] }
   0xf   :  { %228 = vmatpush.msk.msra.mxu0 %vm87_vm0, %v71_v0  ;;  %233 = vmatpush.msk.msra.mxu3 %vm87_vm0, %v71_v0  ;;  %v68_v2 = vld [vmem:[#allocation2] sm:$0xff]  ;;  %vm80_vm1 = vcmask 80896   ;;  %v69_v3 = vld [vmem:[#allocation2 + $0x8] sm:$0xff]  ;;  %v75_v4 = vld [vmem:[#allocation7 + $0x18] sm:$0xff]  ;;  %v363_v55 = vmov 1.0   ;;  %vm176_vm4 = vcmask 261120  }
  0x10   :  { %v74_v5 = vld [vmem:[#allocation7 + $0x10] sm:$0xff]  ;;  %v246_v6 = vld [vmem:[%s431_s2] ss:$0 sm:$0xff]  ;;  %195 = vmatpush.msra.mxu1 %v75_v4  ;;  %235 = vmatpush.msra.mxu2 %v75_v4  ;;  %v73_v7 = vld [vmem:[#allocation7 + $0x8] sm:$0xff]  ;;  %s364_s10 = smov [#allocation8]   ;;  %s214_s14 = sshll.u32 %s434_s5, 4  ;;  %s215_s14 = int_to_ptr.hbm [resolvable:$true] %s214_s14 }
  0x11   :  { %106 = vmatpush.msra.mxu0 %v70_v1  ;;  %234 = vmatpush.msra.mxu3 %v70_v1  ;;  %v72_v9 = vld [vmem:[#allocation7] sm:$0xff]  ;;  %s212_s11 = sshll.u32 %s364_s10, 4  ;;  %s213_s11 = int_to_ptr.vmem [resolvable:$true] %s212_s11 }
  0x12   :  { %229 = vmatmul.msk.f32.vlgmr.msra.gmra.mxu0 %vm80_vm1, %v68_v2  ;;  %230 = vmatmul.msk.f32.vlgmr.msra.gmra.mxu3 %vm80_vm1, %v69_v3 }
  0x13   :  { %196 = vmatpush.msra.mxu1 %v74_v5  ;;  %236 = vmatpush.msra.mxu2 %v74_v5 }
  0x15   :  { %197 = vmatpush.msra.mxu1 %v73_v7  ;;  %237 = vmatpush.msra.mxu2 %v73_v7 }
  0x17   :  { %198 = vmatpush.msra.mxu1 %v72_v9  ;;  %238 = vmatpush.msra.mxu2 %v72_v9 }
  0x8f   :  { %v108_v8 = vpop.f32.mrf.mxu0 }
  0x90   :  { %v109_v10 = vadd.f32 %v246_v6, %v108_v8 }
  0x92   :  { %v116_v11 = vmul.f32 0.70710677, %v109_v10  ;;  %v114_v60 = vmul.f32 0.5, %v109_v10 }
  0x94   :  { %v122_v12 = vand.u32 2147483647, %v116_v11  ;;  %vm118_vm2 = vcmp.lt.f32.partialorder %v116_v11, 0.0 }
  0x95   :  { %v111_v13 = vpop.f32.mrf.mxu3  ;;  %v120_v56 = vsel %vm118_vm2, -1.0, %v363_v55 }
  0x96   :  { %v124_v14 = vmul.f32 0.3275911, %v122_v12  ;;  %v112_v15 = vadd.f32 %v246_v6, %v111_v13  ;;  %v154_v26 = vsub.f32 0.0, %v122_v12  ;;  %v247_v6 = vld [vmem:[%s433_s4] ss:$0 sm:$0xff] }
  0x98   :  { %v126_v16 = vadd.f32 1.0, %v124_v14  ;;  %v117_v17 = vmul.f32 0.70710677, %v112_v15  ;;  %v156_v31 = vmul.f32 %v154_v26, %v122_v12  ;;  %v115_v3 = vmul.f32 0.5, %v112_v15 }
  0x9a   :  { %248 = vrcp.f32 %v126_v16  ;;  %v123_v18 = vand.u32 2147483647, %v117_v17  ;;  %v158_v37 = vmul.f32 1.442695, %v156_v31  ;;  %vm119_vm3 = vcmp.lt.f32.partialorder %v117_v17, 0.0 }
  0x9b   :  { %v121_v1 = vsel %vm119_vm3, -1.0, %v363_v55 }
  0x9c   :  { %v125_v19 = vmul.f32 0.3275911, %v123_v18  ;;  %v155_v34 = vsub.f32 0.0, %v123_v18 }
  0x9e   :  { %v127_v20 = vadd.f32 1.0, %v125_v19  ;;  %v157_v40 = vmul.f32 %v155_v34, %v123_v18 }
  0xa0   :  { %v249_v21 = vpop.eup %248  ;;  %250 = vrcp.f32 %v127_v20  ;;  %v160_v45 = vmul.f32 1.442695, %v157_v40 }
  0xa1   :  { %v130_v22 = vmul.f32 %v249_v21, %v126_v16  ;;  %252 = vpow2.f32 %v158_v37 }
  0xa2   :  { %254 = vpow2.f32 %v160_v45 }
  0xa3   :  { %v132_v23 = vsub.f32 2.0, %v130_v22 }
  0xa5   :  { %v134_v24 = vmul.f32 %v249_v21, %v132_v23 }
  0xa6   :  { %v251_v25 = vpop.eup %250 }
  0xa7   :  { %v131_v27 = vmul.f32 %v251_v25, %v127_v20  ;;  %v136_v28 = vmul.f32 1.0614054, %v134_v24  ;;  %v253_v50 = vpop.eup %252 }
  0xa8   :  { %v255_v59 = vpop.eup %254 }
  0xa9   :  { %v133_v29 = vsub.f32 2.0, %v131_v27  ;;  %v138_v30 = vadd.f32 -1.4531521, %v136_v28 }
  0xab   :  { %v135_v32 = vmul.f32 %v251_v25, %v133_v29  ;;  %v140_v33 = vmul.f32 %v138_v30, %v134_v24 }
  0xad   :  { %v142_v35 = vadd.f32 1.4214138, %v140_v33  ;;  %v137_v36 = vmul.f32 1.0614054, %v135_v32 }
  0xaf   :  { %v144_v38 = vmul.f32 %v142_v35, %v134_v24  ;;  %v139_v39 = vadd.f32 -1.4531521, %v137_v36 }
  0xb1   :  { %v146_v41 = vadd.f32 -0.28449672, %v144_v38  ;;  %v141_v42 = vmul.f32 %v139_v39, %v135_v32 }
  0xb3   :  { %v148_v43 = vmul.f32 %v146_v41, %v134_v24  ;;  %v143_v44 = vadd.f32 1.4214138, %v141_v42 }
  0xb5   :  { %v150_v46 = vadd.f32 0.2548296, %v148_v43  ;;  %v145_v47 = vmul.f32 %v143_v44, %v135_v32 }
  0xb7   :  { %v152_v48 = vmul.f32 %v150_v46, %v134_v24  ;;  %v147_v49 = vadd.f32 -0.28449672, %v145_v47 }
  0xb9   :  { %v162_v51 = vmul.f32 %v253_v50, %v152_v48  ;;  %v149_v52 = vmul.f32 %v147_v49, %v135_v32 }
  0xbb   :  { %v164_v53 = vsub.f32 1.0, %v162_v51  ;;  %v151_v54 = vadd.f32 0.2548296, %v149_v52 }
  0xbd   :  { %v166_v57 = vmul.f32 %v164_v53, %v120_v56  ;;  %v153_v58 = vmul.f32 %v151_v54, %v135_v32 }
  0xbf   :  { %v168_v61 = vadd.f32 1.0, %v166_v57  ;;  %v163_v62 = vmul.f32 %v255_v59, %v153_v58 }
  0xc1   :  { %v170_v63 = vmul.f32 %v168_v61, %v114_v60  ;;  %v165_v0 = vsub.f32 1.0, %v163_v62 }
  0xc3   :  { %231 = vmatmul.msk.f32.vlgmr.msra.gmra.mxu1 %vm176_vm4, %v170_v63  ;;  %v167_v2 = vmul.f32 %v165_v0, %v121_v1 }
  0xc5   :  { %v169_v4 = vadd.f32 1.0, %v167_v2 }
  0xc7   :  { %v171_v5 = vmul.f32 %v169_v4, %v115_v3 }
  0xc9   :  { %232 = vmatmul.msk.f32.vlgmr.msra.gmra.mxu2 %vm176_vm4, %v171_v5 }
 0x140   :  { %v200_v7 = vpop.f32.mrf.mxu1 }
 0x141   :  { %v201_v8 = vadd.f32 %v247_v6, %v200_v7 }
 0x143   :  { %206 = vst.msk [vmem:[#allocation8] sm:$0xff] %vm176_vm4, %v201_v8 }
 0x14c   :  { %v203_v9 = vpop.f32.mrf.mxu2 }
 0x14d   :  { %v204_v10 = vadd.f32 %v247_v6, %v203_v9 }
 0x14f   :  { %207 = vst.msk [vmem:[#allocation8 + $0x8] sm:$0xff] %vm176_vm4, %v204_v10 }
 0x150   :  { %220 = dma.vmem_to_hbm [thread:$0]  %s213_s11, 256, %s215_s14, [#allocation4], %s359_s26, %s359_s26, %s360_s27  }
 0x151   :  { %356 = dma.done.wait [#allocation4], 256  }
 0x152   :  { %357 = vsyncadd [#allocation4], 4294967040 }
 0x153   :  { %225 = vsyncpa [#allocation3], 1 }
 0x154   :  { %226 = vsyncpa [#allocation6], 1 }
 0x155   :  { %227 = vsyncpa [#allocation4], 1 }

</bundles_post_ra>
